<compile_context>
chip_gen: v6e
topology: v6e:2x2x1
jax: 0.10.0
libtpu: 0.0.40
codegen_flags: <defaults>
</compile_context>

<pallas_src>
import functools

import jax
import jax.numpy as jnp
from jax.experimental import pallas as pl
from jax.experimental.pallas import tpu as pltpu

HIDDEN = 32
NODE_FEATURES = 8
OUT_FEATURES = 1
DEPTH = 2

_MAX_EDGE_BLOCK = 1024            # edge rows per grid step (amortizes ~0.35us/step)
_ONEHOT_VMEM_BUDGET = 4 << 20     # bytes allowed for the in-kernel (eb, 2N) f32 mask


def _round_up(v, m):
    return ((v + m - 1) // m) * m


def _edge_block(e_pad, num_nodes):
    """Largest edge block such that the in-kernel (eb, 2N) f32 selection mask stays
    within _ONEHOT_VMEM_BUDGET (keeps the kernel far under v7x's 64 MiB VMEM)."""
    cap = max(128, (_ONEHOT_VMEM_BUDGET // (8 * num_nodes)) // 128 * 128)
    eb = min(_MAX_EDGE_BLOCK, cap)
    return e_pad if e_pad <= eb else eb


def _pad_edges(num_edges, num_nodes):
    e_min = _round_up(max(num_edges, 8), 8)
    eb = _edge_block(e_min, num_nodes)
    return e_min if e_min <= eb else _round_up(num_edges, eb)


# ----------------------------------------------------------------------------
# Fused per-layer EGNN kernel:
#   step 0  : zero agg, project resident h -> p = [h@W_hi ; h@W_hj]   (reassociation)
#   each blk: build gather/scatter masks from int32 index streams, message MLP,
#             in-VMEM sum aggregation
#   last blk: update MLP + layer norm + residual epilogue
# ----------------------------------------------------------------------------
def _egnn_layer_kernel(n, h_ref, dist_ref, dstc_ref, srcc_ref, dstr_ref,
                       w1hi_ref, w1hj_ref, w1d_ref, b1_ref,
                       w2_ref, b2_ref,
                       w3h_ref, w3a_ref, b3_ref,
                       w4_ref, b4_ref,
                       gamma_ref, beta_ref,
                       out_ref, agg_ref, p_ref):
    step = pl.program_id(0)
    eb = dstc_ref.shape[0]

    @pl.when(step == 0)
    def _():
        agg_ref[...] = jnp.zeros_like(agg_ref)
        h0 = h_ref[...]
        # reassociated first message matmul: two (N,H)@(H,H) matmuls ONCE per layer,
        # instead of two (eb,H)@(H,H) matmuls per edge block.
        p_ref[0:n, :] = jnp.dot(h0, w1hi_ref[...], preferred_element_type=jnp.float32)
        p_ref[n:2 * n, :] = jnp.dot(h0, w1hj_ref[...],
                                    preferred_element_type=jnp.float32)

    dst_c = dstc_ref[...]                       # (eb, 1) receiver ids, -1 = padding
    src_c = srcc_ref[...]                       # (eb, 1) sender ids,   -1 = padding
    # K-stacked gather mask built in-kernel from the int32 index streams: dst selects
    # rows [0, N) of p (= h@W_hi), src selects rows [N, 2N) (= h@W_hj). Padded edges
    # (-1) select nothing.
    ids2 = jax.lax.broadcasted_iota(jnp.int32, (eb, 2 * n), 1)
    src_s = jnp.where(src_c >= 0, src_c + n, -1)
    gather_oh = ((ids2 == dst_c) | (ids2 == src_s)).astype(jnp.float32)

    # single MXU gather matmul (K = 2N): rows = h[dst]@W_hi + h[src]@W_hj
    m = jnp.dot(gather_oh, p_ref[...], preferred_element_type=jnp.float32)
    m = m + dist_ref[...] * w1d_ref[...] + b1_ref[...]     # (eb,1)*(1,H) VPU broadcast
    m = m * jax.nn.sigmoid(m)                              # swish (exp/recip -> EUP)
    m = jnp.dot(m, w2_ref[...], preferred_element_type=jnp.float32) + b2_ref[...]
    m = m * jax.nn.sigmoid(m)

    # sum aggregation per receiver: scatter-add as (N, eb) @ (eb, H). The receiver
    # mask is built directly in its transposed layout from the lane-major index
    # stream, so no XLU transpose and no HBM one-hot. Padded edges give zero columns.
    row_ids = jax.lax.broadcasted_iota(jnp.int32, (n, eb), 0)
    scatter_oh = (row_ids == dstr_ref[...]).astype(jnp.float32)
    agg_ref[...] += jnp.dot(scatter_oh, m, preferred_element_type=jnp.float32)

    @pl.when(step == pl.num_programs(0) - 1)
    def _():
        h = h_ref[...]
        # update MLP with split weights (no width-64 concat)
        u = (jnp.dot(h, w3h_ref[...], preferred_element_type=jnp.float32)
             + jnp.dot(agg_ref[...], w3a_ref[...], preferred_element_type=jnp.float32)
             + b3_ref[...])
        u = u * jax.nn.sigmoid(u)
        u = jnp.dot(u, w4_ref[...], preferred_element_type=jnp.float32) + b4_ref[...]
        # layer norm + residual fused as kernel epilogue (all f32)
        mu = jnp.mean(u, axis=-1, keepdims=True)
        var = jnp.mean((u - mu) ** 2, axis=-1, keepdims=True)
        ln = (u - mu) * jax.lax.rsqrt(var + 1e-5) * gamma_ref[...] + beta_ref[...]
        out_ref[...] = h + ln


def _pallas_egnn_layer(h, dist, dst, src, wb):
    n, hidden = h.shape
    e_pad = dst.shape[0]
    eb = _edge_block(e_pad, n)
    grid = (e_pad // eb,)

    dst_col = dst.reshape(e_pad, 1)
    src_col = src.reshape(e_pad, 1)
    dst_row = dst.reshape(1, e_pad)
    dist2 = dist.reshape(e_pad, 1)

    res = lambda i: (0, 0)          # resident block (same tile every grid step)
    erow = lambda i: (i, 0)         # edge-blocked rows

    mats = (wb["w1_hi"], wb["w1_hj"], wb["w1_d"], wb["b1"],
            wb["w2"], wb["b2"],
            wb["w3_h"], wb["w3_a"], wb["b3"],
            wb["w4"], wb["b4"],
            wb["ln_g"], wb["ln_b"])

    in_specs = ([pl.BlockSpec((n, hidden), res),           # h (VMEM-resident)
                 pl.BlockSpec((eb, 1), erow),               # dist
                 pl.BlockSpec((eb, 1), erow),               # dst (column layout)
                 pl.BlockSpec((eb, 1), erow),               # src (column layout)
                 pl.BlockSpec((1, eb), lambda i: (0, i))]   # dst (lane layout, scatter)
                + [pl.BlockSpec(m.shape, res) for m in mats])

    return pl.pallas_call(
        functools.partial(_egnn_layer_kernel, n),
        out_shape=jax.ShapeDtypeStruct((n, hidden), jnp.float32),
        grid_spec=pltpu.PrefetchScalarGridSpec(
            num_scalar_prefetch=0,
            grid=grid,
            in_specs=in_specs,
            out_specs=pl.BlockSpec((n, hidden), res),
            scratch_shapes=[pltpu.VMEM((n, hidden), jnp.float32),        # agg
                            pltpu.VMEM((2 * n, hidden), jnp.float32)]),  # p=[h@Whi;h@Whj]
        compiler_params=pltpu.CompilerParams(
            dimension_semantics=("arbitrary",),       # agg accumulates across edge axis
            vmem_limit_bytes=32 * 1024 * 1024),
    )(h, dist2, dst_col, src_col, dst_row, *mats)


def _egnn_layer_ref(h, dist, dst, src, wb):
    """Pure-JAX forward of the fused layer (indexed gather + segment_sum, same f32
    math). Used only inside the custom_vjp backward via jax.vjp so force = -dE/dpos
    differentiates through the Pallas layer; padded edges are masked explicitly."""
    n = h.shape[0]
    valid = (dst >= 0)
    dst_c = jnp.where(valid, dst, 0)
    src_c = jnp.where(src >= 0, src, 0)
    p_hi = h @ wb["w1_hi"]
    p_hj = h @ wb["w1_hj"]
    m = p_hi[dst_c] + p_hj[src_c] + dist * wb["w1_d"] + wb["b1"]
    m = m * jax.nn.sigmoid(m)
    m = m @ wb["w2"] + wb["b2"]
    m = m * jax.nn.sigmoid(m)
    m = m * valid[:, None].astype(m.dtype)                      # mask padded edges
    agg = jnp.zeros((n, h.shape[1]), m.dtype).at[dst_c].add(m)  # sum aggregation
    u = h @ wb["w3_h"] + agg @ wb["w3_a"] + wb["b3"]
    u = u * jax.nn.sigmoid(u)
    u = u @ wb["w4"] + wb["b4"]
    mu = jnp.mean(u, axis=-1, keepdims=True)
    var = jnp.mean((u - mu) ** 2, axis=-1, keepdims=True)
    ln = (u - mu) * jax.lax.rsqrt(var + 1e-5) * wb["ln_g"] + wb["ln_b"]
    return h + ln


@jax.custom_vjp
def egnn_layer(h, dist, dst, src, wb):
    return _pallas_egnn_layer(h, dist, dst, src, wb)


def _egnn_layer_fwd(h, dist, dst, src, wb):
    return _pallas_egnn_layer(h, dist, dst, src, wb), (h, dist, dst, src, wb)


def _egnn_layer_bwd(res, g):
    h, dist, dst, src, wb = res
    _, vjp = jax.vjp(_egnn_layer_ref, h, dist, dst, src, wb)
    return vjp(g)   # int index args get float0 cotangents, as custom_vjp expects


egnn_layer.defvjp(_egnn_layer_fwd, _egnn_layer_bwd)


# ----------------------------------------------------------------------------
# Parameters
# ----------------------------------------------------------------------------
def _init_linear(key, fan_in, fan_out):
    kw, kb = jax.random.split(key)
    bound = 1.0 / float(fan_in) ** 0.5
    w = jax.random.uniform(kw, (fan_in, fan_out), jnp.float32, -bound, bound)
    b = jax.random.uniform(kb, (fan_out,), jnp.float32, -bound, bound)
    return w, b


def init_params(key, node_features=NODE_FEATURES, hidden=HIDDEN,
                out_features=OUT_FEATURES, depth=DEPTH):
    keys = jax.random.split(key, 3 + depth)
    e_w, e_b = _init_linear(keys[0], node_features, hidden)
    p1_w, p1_b = _init_linear(keys[1], hidden, hidden)
    p2_w, p2_b = _init_linear(keys[2], hidden, out_features)
    params = {"emb_in": {"w": e_w, "b": e_b},
              "pred1": {"w": p1_w, "b": p1_b},
              "pred2": {"w": p2_w, "b": p2_b},
              "layers": []}
    for l in range(depth):
        lk = jax.random.split(keys[3 + l], 4)
        m1_w, m1_b = _init_linear(lk[0], 2 * hidden + 1, hidden)  # msg MLP in (concat-free split)
        m2_w, m2_b = _init_linear(lk[1], hidden, hidden)
        u1_w, u1_b = _init_linear(lk[2], 2 * hidden, hidden)      # upd MLP in (concat-free split)
        u2_w, u2_b = _init_linear(lk[3], hidden, hidden)
        params["layers"].append({
            "w1_hi": m1_w[:hidden],
            "w1_hj": m1_w[hidden:2 * hidden],
            "w1_d": m1_w[2 * hidden:],                 # (1, hidden)
            "b1": m1_b.reshape(1, hidden),
            "w2": m2_w, "b2": m2_b.reshape(1, hidden),
            "w3_h": u1_w[:hidden], "w3_a": u1_w[hidden:],
            "b3": u1_b.reshape(1, hidden),
            "w4": u2_w, "b4": u2_b.reshape(1, hidden),
            "ln_g": jnp.ones((1, hidden), jnp.float32),
            "ln_b": jnp.zeros((1, hidden), jnp.float32),
        })
    return params


# ----------------------------------------------------------------------------
# EGNN forward (energy + force)
# ----------------------------------------------------------------------------
def egnn_energy(params, pos, x, edge_index, cell_offset, unit_cell,
                batch_vec, num_graphs, dst_pad, src_pad, e_pad):
    num_edges = edge_index.shape[1]

    # emb_in: (N, F)@(F, H) is too tiny for a pallas_call (dispatch overhead) -> XLA.
    h = x @ params["emb_in"]["w"] + params["emb_in"]["b"]

    # PBCConvLayer in plain XLA (review: dedicated pallas_call on (E,3) is pure
    # dispatch overhead); differentiable w.r.t. pos for the force path.
    pos_i = pos[edge_index[0]]                      # receiver i
    pos_j = pos[edge_index[1]]                      # sender j ("to_move")
    adj = cell_offset @ unit_cell                   # pbc_adjustments
    diff = (pos_j - adj) - pos_i
    dist = jnp.sqrt(jnp.sum(diff * diff, axis=-1, keepdims=True))   # (E, 1)
    if e_pad > num_edges:
        dist = jnp.concatenate(
            [dist, jnp.zeros((e_pad - num_edges, 1), jnp.float32)], axis=0)

    for lp in params["layers"]:                     # one fused Pallas call per layer
        h = egnn_layer(h, dist, dst_pad, src_pad, lp)

    # pool='add' + prediction head: tiny (num_graphs, H) work -> XLA.
    pooled = jnp.zeros((num_graphs, h.shape[1]), h.dtype).at[batch_vec].add(h)
    e = jax.nn.relu(pooled @ params["pred1"]["w"] + params["pred1"]["b"])
    e = e @ params["pred2"]["w"] + params["pred2"]["b"]
    return e                                        # (num_graphs, out_features)


def egnn_forward(params, x, pos, edge_index, cell_offset, unit_cell,
                 batch_vec, num_graphs, train_flag=True):
    num_nodes = x.shape[0]
    num_edges = edge_index.shape[1]
    e_pad = _pad_edges(num_edges, num_nodes)

    dst_pad = edge_index[0].astype(jnp.int32)
    src_pad = edge_index[1].astype(jnp.int32)
    if e_pad > num_edges:                           # -1 sentinel -> zero mask rows/cols
        fill = jnp.full((e_pad - num_edges,), -1, jnp.int32)
        dst_pad = jnp.concatenate([dst_pad, fill])
        src_pad = jnp.concatenate([src_pad, fill])

    def scalar_energy(p):
        e = egnn_energy(params, p, x, edge_index, cell_offset, unit_cell,
                        batch_vec, num_graphs, dst_pad, src_pad, e_pad)
        # grad_outputs=ones_like(energy)  <=>  grad of sum(energy)
        return jnp.sum(e), e

    (_, energy), dpos = jax.value_and_grad(scalar_energy, has_aux=True)(pos)
    force = -1.0 * dpos
    return energy, force


# ----------------------------------------------------------------------------
# Driver
# ----------------------------------------------------------------------------
if __name__ == "__main__":
    key = jax.random.PRNGKey(0)
    k_param, k_x, k_pos = jax.random.split(key, 3)

    num_graphs = 2
    nodes_per_graph = 8
    N = num_graphs * nodes_per_graph

    x = jax.random.normal(k_x, (N, NODE_FEATURES), jnp.float32)
    unit_cell = 5.0 * jnp.eye(3, dtype=jnp.float32)
    pos = jax.random.uniform(k_pos, (N, 3), jnp.float32, 0.0, 5.0)

    # directed ring edges within each graph; PBC offset +-1 along x at the wrap-around edge
    dsts, srcs, offs = [], [], []
    for g in range(num_graphs):
        base = g * nodes_per_graph
        for i in range(nodes_per_graph):
            j = (i + 1) % nodes_per_graph
            dsts.append(base + i); srcs.append(base + j)
            offs.append([1.0, 0.0, 0.0] if j < i else [0.0, 0.0, 0.0])
            dsts.append(base + j); srcs.append(base + i)
            offs.append([-1.0, 0.0, 0.0] if j < i else [0.0, 0.0, 0.0])
    edge_index = jnp.array([dsts, srcs], dtype=jnp.int32)      # (2, E), E = 32
    cell_offset = jnp.array(offs, dtype=jnp.float32)           # (E, 3)
    batch_vec = jnp.repeat(jnp.arange(num_graphs, dtype=jnp.int32), nodes_per_graph)

    params = init_params(k_param)

    fwd = jax.jit(functools.partial(egnn_forward, params),
                  static_argnames=("num_graphs", "train_flag"))
    energy, force = fwd(x, pos, edge_index, cell_offset, unit_cell,
                        batch_vec, num_graphs=num_graphs, train_flag=True)
    jax.block_until_ready((energy, force))

    assert energy.shape == (num_graphs, OUT_FEATURES)
    assert force.shape == pos.shape
    assert bool(jnp.all(jnp.isfinite(energy))) and bool(jnp.all(jnp.isfinite(force)))
    print("KERNEL_OK")
</pallas_src>

<mosaic_0001>
module attributes {stable_mosaic.version = 11 : i64} {
  func.func @_egnn_layer_kernel(%arg0: i32, %arg1: memref<16x32xf32, #tpu.memory_space<vmem>>, %arg2: memref<32x1xf32, #tpu.memory_space<vmem>>, %arg3: memref<32x1xi32, #tpu.memory_space<vmem>>, %arg4: memref<32x1xi32, #tpu.memory_space<vmem>>, %arg5: memref<1x32xi32, #tpu.memory_space<vmem>>, %arg6: memref<32x32xf32, #tpu.memory_space<vmem>>, %arg7: memref<32x32xf32, #tpu.memory_space<vmem>>, %arg8: memref<1x32xf32, #tpu.memory_space<vmem>>, %arg9: memref<1x32xf32, #tpu.memory_space<vmem>>, %arg10: memref<32x32xf32, #tpu.memory_space<vmem>>, %arg11: memref<1x32xf32, #tpu.memory_space<vmem>>, %arg12: memref<32x32xf32, #tpu.memory_space<vmem>>, %arg13: memref<32x32xf32, #tpu.memory_space<vmem>>, %arg14: memref<1x32xf32, #tpu.memory_space<vmem>>, %arg15: memref<32x32xf32, #tpu.memory_space<vmem>>, %arg16: memref<1x32xf32, #tpu.memory_space<vmem>>, %arg17: memref<1x32xf32, #tpu.memory_space<vmem>>, %arg18: memref<1x32xf32, #tpu.memory_space<vmem>>, %arg19: memref<16x32xf32, #tpu.memory_space<vmem>>, %arg20: memref<16x32xf32, #tpu.memory_space<vmem>>, %arg21: memref<32x32xf32, #tpu.memory_space<vmem>>) attributes {dimension_semantics = [#tpu.dimension_semantics<arbitrary>], iteration_bounds = array<i64: 1>, scalar_prefetch = 0 : i64, scratch_operands = 2 : i64, tpu.core_type = #tpu.core_type<tc>, window_params = [{pipeline_mode = #tpu.pipeline_mode<synchronous>, transform_indices = @transform_0, window_bounds = array<i64: 16, 32>}, {transform_indices = @transform_1, window_bounds = array<i64: 32, 1>}, {transform_indices = @transform_2, window_bounds = array<i64: 32, 1>}, {transform_indices = @transform_3, window_bounds = array<i64: 32, 1>}, {transform_indices = @transform_4, window_bounds = array<i64: 1, 32>}, {pipeline_mode = #tpu.pipeline_mode<synchronous>, transform_indices = @transform_5, window_bounds = array<i64: 32, 32>}, {pipeline_mode = #tpu.pipeline_mode<synchronous>, transform_indices = @transform_6, window_bounds = array<i64: 32, 32>}, {pipeline_mode = #tpu.pipeline_mode<synchronous>, transform_indices = @transform_7, window_bounds = array<i64: 1, 32>}, {pipeline_mode = #tpu.pipeline_mode<synchronous>, transform_indices = @transform_8, window_bounds = array<i64: 1, 32>}, {pipeline_mode = #tpu.pipeline_mode<synchronous>, transform_indices = @transform_9, window_bounds = array<i64: 32, 32>}, {pipeline_mode = #tpu.pipeline_mode<synchronous>, transform_indices = @transform_10, window_bounds = array<i64: 1, 32>}, {pipeline_mode = #tpu.pipeline_mode<synchronous>, transform_indices = @transform_11, window_bounds = array<i64: 32, 32>}, {pipeline_mode = #tpu.pipeline_mode<synchronous>, transform_indices = @transform_12, window_bounds = array<i64: 32, 32>}, {pipeline_mode = #tpu.pipeline_mode<synchronous>, transform_indices = @transform_13, window_bounds = array<i64: 1, 32>}, {pipeline_mode = #tpu.pipeline_mode<synchronous>, transform_indices = @transform_14, window_bounds = array<i64: 32, 32>}, {pipeline_mode = #tpu.pipeline_mode<synchronous>, transform_indices = @transform_15, window_bounds = array<i64: 1, 32>}, {pipeline_mode = #tpu.pipeline_mode<synchronous>, transform_indices = @transform_16, window_bounds = array<i64: 1, 32>}, {pipeline_mode = #tpu.pipeline_mode<synchronous>, transform_indices = @transform_17, window_bounds = array<i64: 1, 32>}, {pipeline_mode = #tpu.pipeline_mode<synchronous>, transform_indices = @transform_18, window_bounds = array<i64: 16, 32>}]} {
    %c0_i32 = arith.constant 0 : i32
    %0 = arith.cmpi eq, %arg0, %c0_i32 : i32
    %1 = arith.extui %0 : i1 to i32
    %c0_i32_0 = arith.constant 0 : i32
    %2 = arith.cmpi ne, %1, %c0_i32_0 : i32
    scf.if %2 {
      %cst_29 = arith.constant 0.000000e+00 : f32
      %60 = vector.broadcast %cst_29 : f32 to vector<16x32xf32>
      %c0_30 = arith.constant 0 : index
      %c0_31 = arith.constant 0 : index
      %61 = vector.load %arg20[%c0_30, %c0_31] : memref<16x32xf32, #tpu.memory_space<vmem>>, vector<16x32xf32>
      tpu.vector_store %arg20[%c0_30, %c0_31], %60 {strides = array<i32>} : memref<16x32xf32, #tpu.memory_space<vmem>>, vector<16x32xf32>,
      %c0_32 = arith.constant 0 : index
      %c0_33 = arith.constant 0 : index
      %62 = vector.load %arg1[%c0_32, %c0_33] : memref<16x32xf32, #tpu.memory_space<vmem>>, vector<16x32xf32>
      %c0_34 = arith.constant 0 : index
      %c0_35 = arith.constant 0 : index
      %63 = vector.load %arg6[%c0_34, %c0_35] : memref<32x32xf32, #tpu.memory_space<vmem>>, vector<32x32xf32>
      %cst_36 = arith.constant dense<0.000000e+00> : vector<16x32xf32>
      %64 = tpu.matmul %62, %63, %cst_36 {dimension_numbers = #tpu.dot_dimension_numbers<[1], [0], [0], [1], [0, 0, 1, 1], [], []>} : vector<16x32xf32>, vector<32x32xf32>, vector<16x32xf32> -> vector<16x32xf32>
      %c0_37 = arith.constant 0 : index
      %c0_38 = arith.constant 0 : index
      %65 = vector.load %arg21[%c0_37, %c0_38] : memref<32x32xf32, #tpu.memory_space<vmem>>, vector<16x32xf32>
      tpu.vector_store %arg21[%c0_37, %c0_38], %64 {strides = array<i32>} : memref<32x32xf32, #tpu.memory_space<vmem>>, vector<16x32xf32>,
      %c0_39 = arith.constant 0 : index
      %c0_40 = arith.constant 0 : index
      %66 = vector.load %arg7[%c0_39, %c0_40] : memref<32x32xf32, #tpu.memory_space<vmem>>, vector<32x32xf32>
      %cst_41 = arith.constant dense<0.000000e+00> : vector<16x32xf32>
      %67 = tpu.matmul %62, %66, %cst_41 {dimension_numbers = #tpu.dot_dimension_numbers<[1], [0], [0], [1], [0, 0, 1, 1], [], []>} : vector<16x32xf32>, vector<32x32xf32>, vector<16x32xf32> -> vector<16x32xf32>
      %c16 = arith.constant 16 : index
      %c0_42 = arith.constant 0 : index
      %68 = vector.load %arg21[%c16, %c0_42] : memref<32x32xf32, #tpu.memory_space<vmem>>, vector<16x32xf32>
      tpu.vector_store %arg21[%c16, %c0_42], %67 {strides = array<i32>} : memref<32x32xf32, #tpu.memory_space<vmem>>, vector<16x32xf32>,
    } else {
    }
    %c0 = arith.constant 0 : index
    %c0_1 = arith.constant 0 : index
    %3 = vector.load %arg3[%c0, %c0_1] : memref<32x1xi32, #tpu.memory_space<vmem>>, vector<32x1xi32>
    %c0_2 = arith.constant 0 : index
    %c0_3 = arith.constant 0 : index
    %4 = vector.load %arg4[%c0_2, %c0_3] : memref<32x1xi32, #tpu.memory_space<vmem>>, vector<32x1xi32>
    %5 = tpu.iota {dimensions = array<i32: 1>} : vector<32x32xi32>
    %c0_i32_4 = arith.constant 0 : i32
    %6 = vector.broadcast %c0_i32_4 : i32 to vector<32x1xi32>
    %7 = arith.cmpi sge, %4, %6 : vector<32x1xi32>
    %c16_i32 = arith.constant 16 : i32
    %8 = vector.broadcast %c16_i32 : i32 to vector<32x1xi32>
    %9 = arith.addi %4, %8 : vector<32x1xi32>
    %c-1_i32 = arith.constant -1 : i32
    %10 = vector.broadcast %c-1_i32 : i32 to vector<32x1xi32>
    %11 = arith.select %7, %9, %10 : vector<32x1xi1>, vector<32x1xi32>
    %12 = vector.broadcast %3 : vector<32x1xi32> to vector<32x32xi32>
    %13 = arith.cmpi eq, %5, %12 : vector<32x32xi32>
    %14 = vector.broadcast %11 : vector<32x1xi32> to vector<32x32xi32>
    %15 = arith.cmpi eq, %5, %14 : vector<32x32xi32>
    %16 = arith.ori %13, %15 : vector<32x32xi1>
    %17 = arith.extui %16 : vector<32x32xi1> to vector<32x32xi32>
    %18 = arith.sitofp %17 : vector<32x32xi32> to vector<32x32xf32>
    %c0_5 = arith.constant 0 : index
    %c0_6 = arith.constant 0 : index
    %19 = vector.load %arg21[%c0_5, %c0_6] : memref<32x32xf32, #tpu.memory_space<vmem>>, vector<32x32xf32>
    %cst = arith.constant dense<0.000000e+00> : vector<32x32xf32>
    %20 = tpu.matmul %18, %19, %cst {dimension_numbers = #tpu.dot_dimension_numbers<[1], [0], [0], [1], [0, 0, 1, 1], [], []>} : vector<32x32xf32>, vector<32x32xf32>, vector<32x32xf32> -> vector<32x32xf32>
    %c0_7 = arith.constant 0 : index
    %c0_8 = arith.constant 0 : index
    %21 = vector.load %arg2[%c0_7, %c0_8] : memref<32x1xf32, #tpu.memory_space<vmem>>, vector<32x1xf32>
    %c0_9 = arith.constant 0 : index
    %c0_10 = arith.constant 0 : index
    %22 = vector.load %arg8[%c0_9, %c0_10] : memref<1x32xf32, #tpu.memory_space<vmem>>, vector<1x32xf32>
    %23 = vector.broadcast %21 : vector<32x1xf32> to vector<32x32xf32>
    %24 = vector.broadcast %22 : vector<1x32xf32> to vector<32x32xf32>
    %25 = arith.mulf %23, %24 : vector<32x32xf32>
    %26 = arith.addf %20, %25 : vector<32x32xf32>
    %c0_11 = arith.constant 0 : index
    %c0_12 = arith.constant 0 : index
    %27 = vector.load %arg9[%c0_11, %c0_12] : memref<1x32xf32, #tpu.memory_space<vmem>>, vector<1x32xf32>
    %28 = vector.broadcast %27 : vector<1x32xf32> to vector<32x32xf32>
    %29 = arith.addf %26, %28 : vector<32x32xf32>
    %30 = arith.negf %29 : vector<32x32xf32>
    %31 = math.exp %30 : vector<32x32xf32>
    %cst_13 = arith.constant 1.000000e+00 : f32
    %32 = vector.broadcast %cst_13 : f32 to vector<32x32xf32>
    %33 = arith.addf %32, %31 : vector<32x32xf32>
    %34 = arith.divf %32, %33 : vector<32x32xf32>
    %35 = arith.mulf %29, %34 : vector<32x32xf32>
    %c0_14 = arith.constant 0 : index
    %c0_15 = arith.constant 0 : index
    %36 = vector.load %arg10[%c0_14, %c0_15] : memref<32x32xf32, #tpu.memory_space<vmem>>, vector<32x32xf32>
    %cst_16 = arith.constant dense<0.000000e+00> : vector<32x32xf32>
    %37 = tpu.matmul %35, %36, %cst_16 {dimension_numbers = #tpu.dot_dimension_numbers<[1], [0], [0], [1], [0, 0, 1, 1], [], []>} : vector<32x32xf32>, vector<32x32xf32>, vector<32x32xf32> -> vector<32x32xf32>
    %c0_17 = arith.constant 0 : index
    %c0_18 = arith.constant 0 : index
    %38 = vector.load %arg11[%c0_17, %c0_18] : memref<1x32xf32, #tpu.memory_space<vmem>>, vector<1x32xf32>
    %39 = vector.broadcast %38 : vector<1x32xf32> to vector<32x32xf32>
    %40 = arith.addf %37, %39 : vector<32x32xf32>
    %41 = arith.negf %40 : vector<32x32xf32>
    %42 = math.exp %41 : vector<32x32xf32>
    %cst_19 = arith.constant 1.000000e+00 : f32
    %43 = vector.broadcast %cst_19 : f32 to vector<32x32xf32>
    %44 = arith.addf %43, %42 : vector<32x32xf32>
    %45 = arith.divf %43, %44 : vector<32x32xf32>
    %46 = arith.mulf %40, %45 : vector<32x32xf32>
    %47 = tpu.iota {dimensions = array<i32: 0>} : vector<16x32xi32>
    %c0_20 = arith.constant 0 : index
    %c0_21 = arith.constant 0 : index
    %48 = vector.load %arg5[%c0_20, %c0_21] : memref<1x32xi32, #tpu.memory_space<vmem>>, vector<1x32xi32>
    %49 = vector.broadcast %48 : vector<1x32xi32> to vector<16x32xi32>
    %50 = arith.cmpi eq, %47, %49 : vector<16x32xi32>
    %51 = arith.extui %50 : vector<16x32xi1> to vector<16x32xi32>
    %52 = arith.sitofp %51 : vector<16x32xi32> to vector<16x32xf32>
    %c0_22 = arith.constant 0 : index
    %c0_23 = arith.constant 0 : index
    %53 = vector.load %arg20[%c0_22, %c0_23] : memref<16x32xf32, #tpu.memory_space<vmem>>, vector<16x32xf32>
    %cst_24 = arith.constant dense<0.000000e+00> : vector<16x32xf32>
    %54 = tpu.matmul %52, %46, %cst_24 {dimension_numbers = #tpu.dot_dimension_numbers<[1], [0], [0], [1], [0, 0, 1, 1], [], []>} : vector<16x32xf32>, vector<32x32xf32>, vector<16x32xf32> -> vector<16x32xf32>
    %55 = arith.addf %53, %54 : vector<16x32xf32>
    %c0_25 = arith.constant 0 : index
    %c0_26 = arith.constant 0 : index
    %56 = vector.load %arg20[%c0_25, %c0_26] : memref<16x32xf32, #tpu.memory_space<vmem>>, vector<16x32xf32>
    tpu.vector_store %arg20[%c0_25, %c0_26], %55 {strides = array<i32>} : memref<16x32xf32, #tpu.memory_space<vmem>>, vector<16x32xf32>,
    %c0_i32_27 = arith.constant 0 : i32
    %57 = arith.cmpi eq, %arg0, %c0_i32_27 : i32
    %58 = arith.extui %57 : i1 to i32
    %c0_i32_28 = arith.constant 0 : i32
    %59 = arith.cmpi ne, %58, %c0_i32_28 : i32
    scf.if %59 {
      %c0_29 = arith.constant 0 : index
      %c0_30 = arith.constant 0 : index
      %60 = vector.load %arg1[%c0_29, %c0_30] : memref<16x32xf32, #tpu.memory_space<vmem>>, vector<16x32xf32>
      %c0_31 = arith.constant 0 : index
      %c0_32 = arith.constant 0 : index
      %61 = vector.load %arg12[%c0_31, %c0_32] : memref<32x32xf32, #tpu.memory_space<vmem>>, vector<32x32xf32>
      %cst_33 = arith.constant dense<0.000000e+00> : vector<16x32xf32>
      %62 = tpu.matmul %60, %61, %cst_33 {dimension_numbers = #tpu.dot_dimension_numbers<[1], [0], [0], [1], [0, 0, 1, 1], [], []>} : vector<16x32xf32>, vector<32x32xf32>, vector<16x32xf32> -> vector<16x32xf32>
      %c0_34 = arith.constant 0 : index
      %c0_35 = arith.constant 0 : index
      %63 = vector.load %arg20[%c0_34, %c0_35] : memref<16x32xf32, #tpu.memory_space<vmem>>, vector<16x32xf32>
      %c0_36 = arith.constant 0 : index
      %c0_37 = arith.constant 0 : index
      %64 = vector.load %arg13[%c0_36, %c0_37] : memref<32x32xf32, #tpu.memory_space<vmem>>, vector<32x32xf32>
      %cst_38 = arith.constant dense<0.000000e+00> : vector<16x32xf32>
      %65 = tpu.matmul %63, %64, %cst_38 {dimension_numbers = #tpu.dot_dimension_numbers<[1], [0], [0], [1], [0, 0, 1, 1], [], []>} : vector<16x32xf32>, vector<32x32xf32>, vector<16x32xf32> -> vector<16x32xf32>
      %66 = arith.addf %62, %65 : vector<16x32xf32>
      %c0_39 = arith.constant 0 : index
      %c0_40 = arith.constant 0 : index
      %67 = vector.load %arg14[%c0_39, %c0_40] : memref<1x32xf32, #tpu.memory_space<vmem>>, vector<1x32xf32>
      %68 = vector.broadcast %67 : vector<1x32xf32> to vector<16x32xf32>
      %69 = arith.addf %66, %68 : vector<16x32xf32>
      %70 = arith.negf %69 : vector<16x32xf32>
      %71 = math.exp %70 : vector<16x32xf32>
      %cst_41 = arith.constant 1.000000e+00 : f32
      %72 = vector.broadcast %cst_41 : f32 to vector<16x32xf32>
      %73 = arith.addf %72, %71 : vector<16x32xf32>
      %74 = arith.divf %72, %73 : vector<16x32xf32>
      %75 = arith.mulf %69, %74 : vector<16x32xf32>
      %c0_42 = arith.constant 0 : index
      %c0_43 = arith.constant 0 : index
      %76 = vector.load %arg15[%c0_42, %c0_43] : memref<32x32xf32, #tpu.memory_space<vmem>>, vector<32x32xf32>
      %cst_44 = arith.constant dense<0.000000e+00> : vector<16x32xf32>
      %77 = tpu.matmul %75, %76, %cst_44 {dimension_numbers = #tpu.dot_dimension_numbers<[1], [0], [0], [1], [0, 0, 1, 1], [], []>} : vector<16x32xf32>, vector<32x32xf32>, vector<16x32xf32> -> vector<16x32xf32>
      %c0_45 = arith.constant 0 : index
      %c0_46 = arith.constant 0 : index
      %78 = vector.load %arg16[%c0_45, %c0_46] : memref<1x32xf32, #tpu.memory_space<vmem>>, vector<1x32xf32>
      %79 = vector.broadcast %78 : vector<1x32xf32> to vector<16x32xf32>
      %80 = arith.addf %77, %79 : vector<16x32xf32>
      %cst_47 = arith.constant dense<0.000000e+00> : vector<16xf32>
      %81 = vector.multi_reduction <add>, %80, %cst_47 [1] : vector<16x32xf32> to vector<16xf32>
      %82 = vector.shape_cast %81 : vector<16xf32> to vector<16x1xf32>
      %cst_48 = arith.constant 3.200000e+01 : f32
      %83 = vector.broadcast %cst_48 : f32 to vector<16x1xf32>
      %84 = arith.divf %82, %83 : vector<16x1xf32>
      %85 = vector.broadcast %84 : vector<16x1xf32> to vector<16x32xf32>
      %86 = arith.subf %80, %85 : vector<16x32xf32>
      %87 = arith.mulf %86, %86 : vector<16x32xf32>
      %cst_49 = arith.constant dense<0.000000e+00> : vector<16xf32>
      %88 = vector.multi_reduction <add>, %87, %cst_49 [1] : vector<16x32xf32> to vector<16xf32>
      %89 = vector.shape_cast %88 : vector<16xf32> to vector<16x1xf32>
      %cst_50 = arith.constant 3.200000e+01 : f32
      %90 = vector.broadcast %cst_50 : f32 to vector<16x1xf32>
      %91 = arith.divf %89, %90 : vector<16x1xf32>
      %92 = vector.broadcast %84 : vector<16x1xf32> to vector<16x32xf32>
      %93 = arith.subf %80, %92 : vector<16x32xf32>
      %cst_51 = arith.constant 9.99999974E-6 : f32
      %94 = vector.broadcast %cst_51 : f32 to vector<16x1xf32>
      %95 = arith.addf %91, %94 : vector<16x1xf32>
      %96 = math.rsqrt %95 : vector<16x1xf32>
      %97 = vector.broadcast %96 : vector<16x1xf32> to vector<16x32xf32>
      %98 = arith.mulf %93, %97 : vector<16x32xf32>
      %c0_52 = arith.constant 0 : index
      %c0_53 = arith.constant 0 : index
      %99 = vector.load %arg17[%c0_52, %c0_53] : memref<1x32xf32, #tpu.memory_space<vmem>>, vector<1x32xf32>
      %100 = vector.broadcast %99 : vector<1x32xf32> to vector<16x32xf32>
      %101 = arith.mulf %98, %100 : vector<16x32xf32>
      %c0_54 = arith.constant 0 : index
      %c0_55 = arith.constant 0 : index
      %102 = vector.load %arg18[%c0_54, %c0_55] : memref<1x32xf32, #tpu.memory_space<vmem>>, vector<1x32xf32>
      %103 = vector.broadcast %102 : vector<1x32xf32> to vector<16x32xf32>
      %104 = arith.addf %101, %103 : vector<16x32xf32>
      %105 = arith.addf %60, %104 : vector<16x32xf32>
      %c0_56 = arith.constant 0 : index
      %c0_57 = arith.constant 0 : index
      %106 = vector.load %arg19[%c0_56, %c0_57] : memref<16x32xf32, #tpu.memory_space<vmem>>, vector<16x32xf32>
      tpu.vector_store %arg19[%c0_56, %c0_57], %105 {strides = array<i32>} : memref<16x32xf32, #tpu.memory_space<vmem>>, vector<16x32xf32>,
    } else {
    }
    return
  }
  func.func @transform_0(%arg0: i32) -> (i32, i32) {
    %c0_i32 = arith.constant 0 : i32
    %c0_i32_0 = arith.constant 0 : i32
    %c0_i32_1 = arith.constant 0 : i32
    return %c0_i32, %c0_i32_0 : i32, i32
  }
  func.func @transform_1(%arg0: i32) -> (i32, i32) {
    %c0_i32 = arith.constant 0 : i32
    %c0_i32_0 = arith.constant 0 : i32
    return %arg0, %c0_i32 : i32, i32
  }
  func.func @transform_2(%arg0: i32) -> (i32, i32) {
    %c0_i32 = arith.constant 0 : i32
    %c0_i32_0 = arith.constant 0 : i32
    return %arg0, %c0_i32 : i32, i32
  }
  func.func @transform_3(%arg0: i32) -> (i32, i32) {
    %c0_i32 = arith.constant 0 : i32
    %c0_i32_0 = arith.constant 0 : i32
    return %arg0, %c0_i32 : i32, i32
  }
  func.func @transform_4(%arg0: i32) -> (i32, i32) {
    %c0_i32 = arith.constant 0 : i32
    %c0_i32_0 = arith.constant 0 : i32
    return %c0_i32, %arg0 : i32, i32
  }
  func.func @transform_5(%arg0: i32) -> (i32, i32) {
    %c0_i32 = arith.constant 0 : i32
    %c0_i32_0 = arith.constant 0 : i32
    %c0_i32_1 = arith.constant 0 : i32
    return %c0_i32, %c0_i32_0 : i32, i32
  }
  func.func @transform_6(%arg0: i32) -> (i32, i32) {
    %c0_i32 = arith.constant 0 : i32
    %c0_i32_0 = arith.constant 0 : i32
    %c0_i32_1 = arith.constant 0 : i32
    return %c0_i32, %c0_i32_0 : i32, i32
  }
  func.func @transform_7(%arg0: i32) -> (i32, i32) {
    %c0_i32 = arith.constant 0 : i32
    %c0_i32_0 = arith.constant 0 : i32
    %c0_i32_1 = arith.constant 0 : i32
    return %c0_i32, %c0_i32_0 : i32, i32
  }
  func.func @transform_8(%arg0: i32) -> (i32, i32) {
    %c0_i32 = arith.constant 0 : i32
    %c0_i32_0 = arith.constant 0 : i32
    %c0_i32_1 = arith.constant 0 : i32
    return %c0_i32, %c0_i32_0 : i32, i32
  }
  func.func @transform_9(%arg0: i32) -> (i32, i32) {
    %c0_i32 = arith.constant 0 : i32
    %c0_i32_0 = arith.constant 0 : i32
    %c0_i32_1 = arith.constant 0 : i32
    return %c0_i32, %c0_i32_0 : i32, i32
  }
  func.func @transform_10(%arg0: i32) -> (i32, i32) {
    %c0_i32 = arith.constant 0 : i32
    %c0_i32_0 = arith.constant 0 : i32
    %c0_i32_1 = arith.constant 0 : i32
    return %c0_i32, %c0_i32_0 : i32, i32
  }
  func.func @transform_11(%arg0: i32) -> (i32, i32) {
    %c0_i32 = arith.constant 0 : i32
    %c0_i32_0 = arith.constant 0 : i32
    %c0_i32_1 = arith.constant 0 : i32
    return %c0_i32, %c0_i32_0 : i32, i32
  }
  func.func @transform_12(%arg0: i32) -> (i32, i32) {
    %c0_i32 = arith.constant 0 : i32
    %c0_i32_0 = arith.constant 0 : i32
    %c0_i32_1 = arith.constant 0 : i32
    return %c0_i32, %c0_i32_0 : i32, i32
  }
  func.func @transform_13(%arg0: i32) -> (i32, i32) {
    %c0_i32 = arith.constant 0 : i32
    %c0_i32_0 = arith.constant 0 : i32
    %c0_i32_1 = arith.constant 0 : i32
    return %c0_i32, %c0_i32_0 : i32, i32
  }
  func.func @transform_14(%arg0: i32) -> (i32, i32) {
    %c0_i32 = arith.constant 0 : i32
    %c0_i32_0 = arith.constant 0 : i32
    %c0_i32_1 = arith.constant 0 : i32
    return %c0_i32, %c0_i32_0 : i32, i32
  }
  func.func @transform_15(%arg0: i32) -> (i32, i32) {
    %c0_i32 = arith.constant 0 : i32
    %c0_i32_0 = arith.constant 0 : i32
    %c0_i32_1 = arith.constant 0 : i32
    return %c0_i32, %c0_i32_0 : i32, i32
  }
  func.func @transform_16(%arg0: i32) -> (i32, i32) {
    %c0_i32 = arith.constant 0 : i32
    %c0_i32_0 = arith.constant 0 : i32
    %c0_i32_1 = arith.constant 0 : i32
    return %c0_i32, %c0_i32_0 : i32, i32
  }
  func.func @transform_17(%arg0: i32) -> (i32, i32) {
    %c0_i32 = arith.constant 0 : i32
    %c0_i32_0 = arith.constant 0 : i32
    %c0_i32_1 = arith.constant 0 : i32
    return %c0_i32, %c0_i32_0 : i32, i32
  }
  func.func @transform_18(%arg0: i32) -> (i32, i32) {
    %c0_i32 = arith.constant 0 : i32
    %c0_i32_0 = arith.constant 0 : i32
    %c0_i32_1 = arith.constant 0 : i32
    return %c0_i32, %c0_i32_0 : i32, i32
  }
}

</mosaic_0001>

<bundles_post_ra>
// kernel: jvp__.2
= control target key start
LH: loop header
LB: loop body
LE: loop exit
PB: predicated region body
PF: predicated region fallthrough
CT: control target
= control target key end

     0   :  { %v1298_v3 = vmov 0   ;;  %vm63_vm0 = vcmask 261120   ;;  %v1299_v18 = vmov 0.0   ;;  %v244_v32 = vlaneseq  ;;  %s1596_s6 = inlined_call_operand.vmem [shape: f32[32,32], index: 6, kind: input, shape index: {}]   ;;  %s1597_s5 = inlined_call_operand.vmem [shape: f32[32,32], index: 5, kind: input, shape index: {}]   ;;  %s1598_s0 = inlined_call_operand.vmem [shape: f32[16,32], index: 0, kind: input, shape index: {}]   ;;  %s1599_s3 = inlined_call_operand.vmem [shape: s32[32,1], index: 3, kind: input, shape index: {}]   ;;  %s1600_s2 = inlined_call_operand.vmem [shape: s32[32,1], index: 2, kind: input, shape index: {}]   ;;  %s1601_s1 = inlined_call_operand.vmem [shape: f32[32,1], index: 1, kind: input, shape index: {}]   ;;  %s1602_s9 = inlined_call_operand.vmem [shape: f32[32,32], index: 9, kind: input, shape index: {}]   ;;  %s1603_s7 = inlined_call_operand.vmem [shape: f32[1,32], index: 7, kind: input, shape index: {}]   ;;  %s1604_s8 = inlined_call_operand.vmem [shape: f32[1,32], index: 8, kind: input, shape index: {}]   ;;  %s1605_s4 = inlined_call_operand.vmem [shape: s32[1,32], index: 4, kind: input, shape index: {}]   ;;  %s1606_s10 = inlined_call_operand.vmem [shape: f32[1,32], index: 10, kind: input, shape index: {}]   ;;  %s1607_s11 = inlined_call_operand.vmem [shape: f32[32,32], index: 11, kind: input, shape index: {}]   ;;  %s1608_s12 = inlined_call_operand.vmem [shape: f32[32,32], index: 12, kind: input, shape index: {}]   ;;  %s1609_s14 = inlined_call_operand.vmem [shape: f32[32,32], index: 14, kind: input, shape index: {}]   ;;  %s1610_s13 = inlined_call_operand.vmem [shape: f32[1,32], index: 13, kind: input, shape index: {}]   ;;  %s1611_s15 = inlined_call_operand.vmem [shape: f32[1,32], index: 15, kind: input, shape index: {}]   ;;  %s1612_s16 = inlined_call_operand.vmem [shape: f32[1,32], index: 16, kind: input, shape index: {}]   ;;  %s1613_s17 = inlined_call_operand.vmem [shape: f32[1,32], index: 17, kind: input, shape index: {}]   ;;  %s1614_s18 = inlined_call_operand.vmem [shape: f32[16,32], index: 18, kind: output, shape index: {}]  }
   0x1   :  { %1619 = sst [smem:[#allocation4_spill]] %s1596_s6  ;;  %1253 = vset.pattern.permute.xlu1 %v1298_v3  ;;  %1252 = vset.pattern.permute.xlu0 %v1298_v3  ;;  %v241_v9 = vld [vmem:[%s1599_s3 + $0x8] sm:$0xff]  ;;  %v240_v11 = vld [vmem:[%s1599_s3] sm:$0xff]  ;;  %v242_v17 = vld [vmem:[%s1599_s3 + $0x10] sm:$0xff]  ;;  %64 = vst.msk [vmem:[#allocation2] sm:$0xff] %vm63_vm0, %v1299_v18 }
   0x2   :  { %1620 = sst [smem:[#allocation5_spill]] %s1597_s5  ;;  %v237_v13 = vld [vmem:[%s1600_s2 + $0x8] sm:$0xff]  ;;  %v251_v14 = vadd.s32 16, %v241_v9  ;;  %v236_v15 = vld [vmem:[%s1600_s2] sm:$0xff]  ;;  %vm247_vm1 = vcmp.ge.s32.totalorder %v241_v9, 0  ;;  %v250_v16 = vadd.s32 16, %v240_v11 }
   0x3   :  { %1621 = sst [smem:[#allocation6_spill]] %s1598_s0  ;;  %65 = vst.msk [vmem:[#allocation2 + $0x8] sm:$0xff] %vm63_vm0, %v1299_v18  ;;  %vm246_vm2 = vcmp.ge.s32.totalorder %v240_v11, 0  ;;  %262 = vperm.xlu1 %1253, %v237_v13   ;;  %259 = vperm.xlu0 %1252, %v236_v15   ;;  %v252_v20 = vadd.s32 16, %v242_v17  ;;  %vm248_vm3 = vcmp.ge.s32.totalorder %v242_v17, 0  ;;  %v243_v22 = vld [vmem:[%s1599_s3 + $0x18] sm:$0xff] }
   0x4   :  { %1622 = sst [smem:[#allocation7_spill]] %s1609_s14  ;;  %v255_v19 = vsel %vm247_vm1, %v251_v14, 4294967295  ;;  %v254_v21 = vsel %vm246_vm2, %v250_v16, 4294967295  ;;  %v253_v24 = vadd.s32 16, %v243_v22  ;;  %v238_v25 = vld [vmem:[%s1600_s2 + $0x10] sm:$0xff]  ;;  %vm249_vm4 = vcmp.ge.s32.totalorder %v243_v22, 0 }
   0x5   :  { %s1623_s29 = sld [smem:[#allocation4_spill]]  ;;  %v256_v23 = vsel %vm248_vm3, %v252_v20, 4294967295  ;;  %v239_v27 = vld [vmem:[%s1600_s2 + $0x18] sm:$0xff]  ;;  %v307_v28 = vld [vmem:[%s1601_s1 + $0x8] sm:$0xff]  ;;  %v306_v29 = vld [vmem:[%s1601_s1] sm:$0xff]  ;;  %v245_v33 = vand.u32 127, %v244_v32 }
   0x6   :  { %s1624_s14 = sld [smem:[#allocation5_spill]]  ;;  %v257_v26 = vsel %vm249_vm4, %v253_v24, 4294967295  ;;  %v309_v30 = vld [vmem:[%s1601_s1 + $0x18] sm:$0xff]  ;;  %v308_v31 = vld [vmem:[%s1601_s1 + $0x10] sm:$0xff]  ;;  %v479_v56 = vld [vmem:[%s1602_s9 + $0x8] sm:$0xff] }
   0x7   :  { %s1625_s30 = sld [smem:[#allocation6_spill]]  ;;  %278 = vperm.xlu1 %1253, %v255_v19   ;;  %275 = vperm.xlu0 %1252, %v254_v21   ;;  %v481_v54 = vld [vmem:[%s1602_s9 + $0x18] sm:$0xff]  ;;  %v480_v55 = vld [vmem:[%s1602_s9 + $0x10] sm:$0xff]  ;;  %v478_v57 = vld [vmem:[%s1602_s9] sm:$0xff] }
   0x8   :  { %v1068_v59 = vld [vmem:[%s1603_s7] ss:$0 sm:$0xff]  ;;  %s1626_s19 = sld [smem:[#allocation7_spill]] }
   0xb   :  { %v158_v0 = vld [vmem:[%s1623_s29 + $0x18] sm:$0xff]  ;;  %v157_v2 = vld [vmem:[%s1623_s29 + $0x10] sm:$0xff]  ;;  %v156_v5 = vld [vmem:[%s1623_s29 + $0x8] sm:$0xff]  ;;  %281 = vperm.xlu1 %1253, %v256_v23   ;;  %265 = vperm.xlu0 %1252, %v238_v25  }
   0xc   :  { %v71_v1 = vld [vmem:[%s1624_s14 + $0x18] sm:$0xff]  ;;  %1167 = vmatprep.subr.mxu1 %v158_v0  ;;  %v70_v4 = vld [vmem:[%s1624_s14 + $0x10] sm:$0xff]  ;;  %v69_v6 = vld [vmem:[%s1624_s14 + $0x8] sm:$0xff] }
   0xd   :  { %1156 = vmatprep.subr.mxu0 %v71_v1  ;;  %1168 = vmatpush3.msra.mxu1 %v158_v0  ;;  %v155_v7 = vld [vmem:[%s1623_s29] sm:$0xff]  ;;  %v1433_v12 = vld [vmem:[%s1625_s30 + $0x8] sm:$0xff] }
   0xe   :  { %1157 = vmatpush3.msra.mxu0 %v71_v1  ;;  %1169 = vmatprep.subr.mxu1 %v157_v2  ;;  %v1419_v8 = vld [vmem:[%s1625_s30] sm:$0xff] }
   0xf   :  { %1158 = vmatprep.subr.mxu0 %v70_v4  ;;  %1170 = vmatpush3.msra.mxu1 %v157_v2  ;;  %v68_v10 = vld [vmem:[%s1624_s14] sm:$0xff] }
  0x10   :  { %1159 = vmatpush3.msra.mxu0 %v70_v4  ;;  %1171 = vmatprep.subr.mxu1 %v156_v5  ;;  %v1073_v0 = vld [vmem:[%s1604_s8] ss:$0 sm:$0xff] }
  0x11   :  { %1160 = vmatprep.subr.mxu0 %v69_v6  ;;  %1172 = vmatpush3.msra.mxu1 %v156_v5 }
  0x12   :  { %1161 = vmatpush3.msra.mxu0 %v69_v6  ;;  %1173 = vmatprep.subr.mxu1 %v155_v7 }
  0x13   :  { %1175 = vmatprep.mubr.msk.f32.mxu1 %vm63_vm0, %v1419_v8  ;;  %1174 = vmatpush3.msra.mxu1 %v155_v7 }
  0x14   :  { %1162 = vmatprep.subr.mxu0 %v68_v10  ;;  %1176 = vmatmul.mubr.msk.f32.vlgmr.msra.gmra.mxu1 %vm63_vm0, %v1433_v12 }
  0x15   :  { %1163 = vmatpush3.msra.mxu0 %v68_v10  ;;  %1164 = vmatprep.mubr.msk.f32.mxu0 %vm63_vm0, %v1419_v8 }
  0x16   :  { %1165 = vmatmul.mubr.msk.f32.vlgmr.msra.gmra.mxu0 %vm63_vm0, %v1433_v12  ;;  %284 = vperm.xlu1 %1253, %v257_v26  }
  0x17   :  { %268 = vperm.xlu0 %1252, %v239_v27   ;;  %1192 = vmatprep.subr.mxu1 %v481_v54 }
  0x18   :  { %1193 = vmatpush3.msra.mxu1 %v481_v54 }
  0x19   :  { %1194 = vmatprep.subr.mxu1 %v480_v55 }
  0x1a   :  { %318 = vperm.xlu1 %1253, %v307_v28   ;;  %1195 = vmatpush3.msra.mxu1 %v480_v55 }
  0x1b   :  { %313 = vperm.xlu0 %1252, %v306_v29   ;;  %1196 = vmatprep.subr.mxu1 %v479_v56 }
  0x1c   :  { %1197 = vmatpush3.msra.mxu1 %v479_v56 }
  0x1d   :  { %1198 = vmatprep.subr.mxu1 %v478_v57 }
  0x1e   :  { %328 = vperm.xlu1 %1253, %v309_v30   ;;  %1199 = vmatpush3.msra.mxu1 %v478_v57 }
  0x1f   :  { %323 = vperm.xlu0 %1252, %v308_v31  }
  0x7e   :  { %v260_v34 = vpop.permute.xlu0 %259  ;;  %v263_v37 = vpop.permute.xlu1 %262 }
  0x7f   :  { %vm270_vm5 = vcmp.eq.s32.totalorder %v245_v33, %v260_v34  ;;  %vm271_vm8 = vcmp.eq.s32.totalorder %v245_v33, %v263_v37 }
  0x82   :  { %v276_v35 = vpop.permute.xlu0 %275  ;;  %v279_v39 = vpop.permute.xlu1 %278 }
  0x83   :  { %vm286_vm6 = vcmp.eq.s32.totalorder %v245_v33, %v276_v35  ;;  %vm287_vm9 = vcmp.eq.s32.totalorder %v245_v33, %v279_v39 }
  0x84   :  { %vm290_vm7 = vmor %vm270_vm5, %vm286_vm6 }
  0x85   :  { %v1064_v36 = vsel %vm290_vm7, 1.0, %v1299_v18  ;;  %vm291_vm12 = vmor %vm271_vm8, %vm287_vm9 }
  0x86   :  { %1186 = vmatprep.mubr.msk.f32.mxu0 %vm63_vm0, %v1064_v36  ;;  %v282_v43 = vpop.permute.xlu1 %281  ;;  %v266_v44 = vpop.permute.xlu0 %265  ;;  %v1065_v51 = vsel %vm291_vm12, 1.0, %v1299_v18 }
  0x87   :  { %vm288_vm10 = vcmp.eq.s32.totalorder %v245_v33, %v282_v43  ;;  %vm272_vm11 = vcmp.eq.s32.totalorder %v245_v33, %v266_v44  ;;  %v1078_v44 = vld [vmem:[%s1606_s10] ss:$0 sm:$0xff] }
  0x88   :  { %vm292_vm13 = vmor %vm272_vm11, %vm288_vm10 }
  0x89   :  { %v1066_v52 = vsel %vm292_vm13, 1.0, %v1299_v18 }
  0x91   :  { %v285_v48 = vpop.permute.xlu1 %284 }
  0x92   :  { %v269_v49 = vpop.permute.xlu0 %268  ;;  %vm289_vm14 = vcmp.eq.s32.totalorder %v245_v33, %v285_v48 }
  0x93   :  { %vm273_vm15 = vcmp.eq.s32.totalorder %v245_v33, %v269_v49 }
  0x94   :  { %vm293_vm1 = vmor %vm273_vm15, %vm289_vm14 }
  0x95   :  { %v1067_v53 = vsel %vm293_vm1, 1.0, %v1299_v18  ;;  %v319_v58 = vpop.permute.xlu1 %318 }
  0x96   :  { %v314_v60 = vpop.permute.xlu0 %313  ;;  %v338_v61 = vmul.f32 %v1068_v59, %v319_v58 }
  0x97   :  { %v337_v1 = vmul.f32 %v1068_v59, %v314_v60 }
  0x99   :  { %v329_v62 = vpop.permute.xlu1 %328 }
  0x9a   :  { %v324_v3 = vpop.permute.xlu0 %323  ;;  %v340_v5 = vmul.f32 %v1068_v59, %v329_v62 }
  0x9b   :  { %v339_v10 = vmul.f32 %v1068_v59, %v324_v3 }
  0xd4   :  { %v1177_v38 = vpop.f32.mrf.mxu1 }
  0xd5   :  { %235 = vst.msk [vmem:[#allocation3 + $0x18] sm:$0xff] %vm63_vm0, %v1177_v38 }
  0xd6   :  { %v1166_v40 = vpop.f32.mrf.mxu0  ;;  %v225_v41 = vpop.f32.mrf.mxu1 }
  0xd7   :  { %154 = vst.msk [vmem:[#allocation3 + $0x8] sm:$0xff] %vm63_vm0, %v1166_v40  ;;  %234 = vst.msk [vmem:[#allocation3 + $0x10] sm:$0xff] %vm63_vm0, %v225_v41  ;;  %v615_v40 = vshrl.u32 %v244_v32, 7 }
  0xd8   :  { %v144_v42 = vpop.f32.mrf.mxu0 }
  0xd9   :  { %153 = vst.msk [vmem:[#allocation3] sm:$0xff] %vm63_vm0, %v144_v42  ;;  %v616_v41 = vadd.s32 8, %v615_v40  ;;  %v1087_v42 = vld [vmem:[%s1605_s4] ss:$0 sm:$0xff] }
  0xda   :  { %vm622_vm2 = vcmp.eq.s32.totalorder %v615_v40, %v1087_v42 }
  0xdb   :  { %vm623_vm3 = vcmp.eq.s32.totalorder %v616_v41, %v1087_v42  ;;  %v1088_v43 = vsel %vm622_vm2, 1.0, %v1299_v18 }
  0xdc   :  { %v305_v45 = vld [vmem:[#allocation3 + $0x18] sm:$0xff] }
  0xdd   :  { %1178 = vmatprep.subr.mxu0 %v305_v45 }
  0xde   :  { %1179 = vmatpush3.msra.mxu0 %v305_v45  ;;  %v304_v46 = vld [vmem:[#allocation3 + $0x10] sm:$0xff]  ;;  %v303_v47 = vld [vmem:[#allocation3 + $0x8] sm:$0xff] }
  0xdf   :  { %1180 = vmatprep.subr.mxu0 %v304_v46 }
  0xe0   :  { %1181 = vmatpush3.msra.mxu0 %v304_v46  ;;  %v302_v50 = vld [vmem:[#allocation3] sm:$0xff] }
  0xe1   :  { %1182 = vmatprep.subr.mxu0 %v303_v47 }
  0xe2   :  { %1183 = vmatpush3.msra.mxu0 %v303_v47 }
  0xe3   :  { %1184 = vmatprep.subr.mxu0 %v302_v50 }
  0xe4   :  { %1185 = vmatpush3.msra.mxu0 %v302_v50 }
  0xe5   :  { %1187 = vmatmul.mubr.msk.f32.vlgmr.msra.gmra.mxu0 %vm63_vm0, %v1065_v51 }
  0xe6   :  { %1189 = vmatprep.mubr.msk.f32.mxu0 %vm63_vm0, %v1066_v52 }
  0xe9   :  { %1190 = vmatmul.mubr.msk.f32.gmra.mxu0 %vm63_vm0, %v1067_v53 }
  0xea   :  { %1214 = vmatprep.mubr.msk.f32.mxu0 %vm63_vm0, %v1088_v43 }
 0x1a5   :  { %v1188_v63 = vpop.f32.mrf.mxu0 }
 0x1a6   :  { %v426_v2 = vadd.f32 %v1188_v63, %v338_v61 }
 0x1a7   :  { %v420_v4 = vpop.f32.mrf.mxu0 }
 0x1a8   :  { %v447_v6 = vadd.f32 %v1073_v0, %v426_v2  ;;  %v421_v7 = vadd.f32 %v420_v4, %v337_v1 }
 0x1a9   :  { %v1191_v9 = vpop.f32.mrf.mxu0 }
 0x1aa   :  { %v1075_v11 = vmul.f32 -1.442695, %v447_v6  ;;  %v446_v13 = vadd.f32 %v1073_v0, %v421_v7  ;;  %v436_v14 = vadd.f32 %v1191_v9, %v340_v5  ;;  %v1089_v9 = vsel %vm623_vm3, 1.0, %v1299_v18  ;;  %v722_v18 = vld [vmem:[%s1607_s11 + $0x10] sm:$0xff] }
 0x1ab   :  { %v430_v15 = vpop.f32.mrf.mxu0 }
 0x1ac   :  { %1254 = vpow2.f32 %v1075_v11  ;;  %v1074_v16 = vmul.f32 -1.442695, %v446_v13  ;;  %v449_v17 = vadd.f32 %v1073_v0, %v436_v14  ;;  %v431_v19 = vadd.f32 %v430_v15, %v339_v10  ;;  %v723_v10 = vld [vmem:[%s1607_s11 + $0x18] sm:$0xff]  ;;  %v721_v14 = vld [vmem:[%s1607_s11 + $0x8] sm:$0xff] }
 0x1ad   :  { %v729_v11 = vld [vmem:[%s1608_s12 + $0x18] sm:$0xff]  ;;  %v727_v15 = vld [vmem:[%s1608_s12 + $0x8] sm:$0xff] }
 0x1ae   :  { %1256 = vpow2.f32 %v1074_v16  ;;  %v1077_v20 = vmul.f32 -1.442695, %v449_v17  ;;  %v448_v21 = vadd.f32 %v1073_v0, %v431_v19  ;;  %1217 = vmatprep.subr.mxu1 %v729_v11  ;;  %v720_v16 = vld [vmem:[%s1607_s11] sm:$0xff]  ;;  %v629_v19 = vld [vmem:[#allocation2 + $0x8] sm:$0xff] }
 0x1b0   :  { %1258 = vpow2.f32 %v1077_v20  ;;  %v1076_v22 = vmul.f32 -1.442695, %v448_v21 }
 0x1b2   :  { %1260 = vpow2.f32 %v1076_v22 }
 0x1b9   :  { %v1255_v23 = vpop.eup %1254 }
 0x1ba   :  { %v463_v24 = vadd.f32 1.0, %v1255_v23 }
 0x1bb   :  { %v1257_v25 = vpop.eup %1256 }
 0x1bc   :  { %v462_v26 = vadd.f32 1.0, %v1257_v25  ;;  %1262 = vrcp.f32 %v463_v24 }
 0x1bd   :  { %v1259_v27 = vpop.eup %1258 }
 0x1be   :  { %1264 = vrcp.f32 %v462_v26  ;;  %v465_v28 = vadd.f32 1.0, %v1259_v27  ;;  %v918_v27 = vld [vmem:[%s1626_s19 + $0x18] sm:$0xff] }
 0x1bf   :  { %v1261_v29 = vpop.eup %1260 }
 0x1c0   :  { %v464_v30 = vadd.f32 1.0, %v1261_v29  ;;  %1266 = vrcp.f32 %v465_v28  ;;  %v917_v28 = vld [vmem:[%s1626_s19 + $0x10] sm:$0xff]  ;;  %v916_v29 = vld [vmem:[%s1626_s19 + $0x8] sm:$0xff] }
 0x1c2   :  { %1268 = vrcp.f32 %v464_v30  ;;  %v915_v30 = vld [vmem:[%s1626_s19] sm:$0xff] }
 0x1c9   :  { %v1263_v31 = vpop.eup %1262 }
 0x1ca   :  { %v475_v35 = vmul.f32 %v1263_v31, %v447_v6 }
 0x1cb   :  { %v1265_v33 = vpop.eup %1264 }
 0x1cc   :  { %v474_v34 = vmul.f32 %v1265_v33, %v446_v13  ;;  %v728_v13 = vld [vmem:[%s1608_s12 + $0x10] sm:$0xff] }
 0x1cd   :  { %v1267_v36 = vpop.eup %1266 }
 0x1ce   :  { %1200 = vmatprep.mubr.msk.f32.mxu1 %vm63_vm0, %v474_v34  ;;  %v477_v39 = vmul.f32 %v1267_v36, %v449_v17  ;;  %v726_v17 = vld [vmem:[%s1608_s12] sm:$0xff] }
 0x1cf   :  { %v1269_v37 = vpop.eup %1268  ;;  %1201 = vmatmul.mubr.msk.f32.vlgmr.msra.gmra.mxu1 %vm63_vm0, %v475_v35  ;;  %v1096_v34 = vld [vmem:[%s1610_s13] ss:$0 sm:$0xff] }
 0x1d0   :  { %v476_v38 = vmul.f32 %v1269_v37, %v448_v21  ;;  %1218 = vmatpush3.msra.mxu1 %v729_v11  ;;  %v628_v21 = vld [vmem:[#allocation2] sm:$0xff] }
 0x1d1   :  { %1219 = vmatprep.subr.mxu1 %v728_v13  ;;  %v1102_v11 = vld [vmem:[%s1612_s16] ss:$0 sm:$0xff] }
 0x1d2   :  { %1203 = vmatprep.mubr.msk.f32.mxu1 %vm63_vm0, %v476_v38  ;;  %1220 = vmatpush3.msra.mxu1 %v728_v13  ;;  %v1103_v13 = vld [vmem:[%s1613_s17] ss:$0 sm:$0xff] }
 0x1d3   :  { %1204 = vmatmul.mubr.msk.f32.gmra.mxu1 %vm63_vm0, %v477_v39  ;;  %1221 = vmatprep.subr.mxu1 %v727_v15 }
 0x1d4   :  { %1222 = vmatpush3.msra.mxu1 %v727_v15 }
 0x1d5   :  { %1223 = vmatprep.subr.mxu1 %v726_v17 }
 0x1d6   :  { %1224 = vmatpush3.msra.mxu1 %v726_v17 }
 0x1d7   :  { %1239 = vmatprep.subr.mxu1 %v918_v27 }
 0x28f   :  { %v1202_v45 = vpop.f32.mrf.mxu1 }
 0x290   :  { %v573_v46 = vadd.f32 %v1202_v45, %v1078_v44 }
 0x291   :  { %v567_v47 = vpop.f32.mrf.mxu1 }
 0x292   :  { %v1084_v48 = vmul.f32 -1.442695, %v573_v46  ;;  %v568_v32 = vadd.f32 %v1078_v44, %v567_v47 }
 0x293   :  { %v1205_v49 = vpop.f32.mrf.mxu1 }
 0x294   :  { %v1083_v50 = vmul.f32 -1.442695, %v568_v32  ;;  %v583_v51 = vadd.f32 %v1205_v49, %v1078_v44  ;;  %1270 = vpow2.f32 %v1084_v48 }
 0x295   :  { %v577_v52 = vpop.f32.mrf.mxu1 }
 0x296   :  { %v1086_v53 = vmul.f32 -1.442695, %v583_v51  ;;  %v578_v54 = vadd.f32 %v1078_v44, %v577_v52  ;;  %1272 = vpow2.f32 %v1083_v50  ;;  %v1099_v50 = vld [vmem:[%s1611_s15] ss:$0 sm:$0xff] }
 0x298   :  { %1274 = vpow2.f32 %v1086_v53  ;;  %v1085_v55 = vmul.f32 -1.442695, %v578_v54 }
 0x29a   :  { %1276 = vpow2.f32 %v1085_v55 }
 0x2a1   :  { %v1271_v56 = vpop.eup %1270 }
 0x2a2   :  { %v599_v59 = vadd.f32 1.0, %v1271_v56 }
 0x2a3   :  { %v1273_v57 = vpop.eup %1272 }
 0x2a4   :  { %v598_v62 = vadd.f32 1.0, %v1273_v57 }
 0x2a5   :  { %v1275_v58 = vpop.eup %1274 }
 0x2a6   :  { %v601_v60 = vadd.f32 1.0, %v1275_v58 }
 0x2a7   :  { %v1277_v61 = vpop.eup %1276 }
 0x2a8   :  { %1278 = vrcp.f32 %v601_v60  ;;  %v600_v63 = vadd.f32 1.0, %v1277_v61 }
 0x2a9   :  { %1280 = vrcp.f32 %v599_v59 }
 0x2aa   :  { %1282 = vrcp.f32 %v600_v63 }
 0x2ab   :  { %1284 = vrcp.f32 %v598_v62 }
 0x2b5   :  { %v1279_v0 = vpop.eup %1278 }
 0x2b6   :  { %v1281_v1 = vpop.eup %1280  ;;  %v613_v2 = vmul.f32 %v1279_v0, %v583_v51 }
 0x2b7   :  { %v1283_v3 = vpop.eup %1282  ;;  %v611_v6 = vmul.f32 %v1281_v1, %v573_v46 }
 0x2b8   :  { %v612_v4 = vmul.f32 %v1283_v3, %v578_v54  ;;  %1206 = vmatprep.subr.mxu0 %v613_v2  ;;  %v1285_v5 = vpop.eup %1284 }
 0x2b9   :  { %1207 = vmatpush3.msra.mxu0 %v613_v2  ;;  %v610_v7 = vmul.f32 %v1285_v5, %v568_v32 }
 0x2ba   :  { %1208 = vmatprep.subr.mxu0 %v612_v4 }
 0x2bb   :  { %1209 = vmatpush3.msra.mxu0 %v612_v4 }
 0x2bc   :  { %1210 = vmatprep.subr.mxu0 %v611_v6 }
 0x2bd   :  { %1211 = vmatpush3.msra.mxu0 %v611_v6 }
 0x2be   :  { %1212 = vmatprep.subr.mxu0 %v610_v7 }
 0x2bf   :  { %1213 = vmatpush3.msra.mxu0 %v610_v7 }
 0x2c0   :  { %1215 = vmatmul.mubr.msk.f32.vlgmr.msra.gmra.mxu0 %vm63_vm0, %v1089_v9  ;;  %1228 = vmatprep.subr.mxu0 %v723_v10 }
 0x2c1   :  { %1236 = vmatprep.mubr.msk.f32.mxu0 %vm63_vm0, %v1419_v8  ;;  %1229 = vmatpush3.msra.mxu0 %v723_v10 }
 0x2c2   :  { %1230 = vmatprep.subr.mxu0 %v722_v18 }
 0x2c3   :  { %1231 = vmatpush3.msra.mxu0 %v722_v18 }
 0x2c4   :  { %1232 = vmatprep.subr.mxu0 %v721_v14 }
 0x2c5   :  { %1233 = vmatpush3.msra.mxu0 %v721_v14 }
 0x2c6   :  { %1234 = vmatprep.subr.mxu0 %v720_v16 }
 0x2c7   :  { %1235 = vmatpush3.msra.mxu0 %v720_v16 }
 0x2c8   :  { %1237 = vmatmul.mubr.msk.f32.vlgmr.msra.gmra.mxu0 %vm63_vm0, %v1433_v12 }
 0x380   :  { %v1216_v20 = vpop.f32.mrf.mxu0 }
 0x381   :  { %v712_v22 = vadd.f32 %v1216_v20, %v629_v19 }
 0x382   :  { %v702_v23 = vpop.f32.mrf.mxu0 }
 0x383   :  { %714 = vst.msk [vmem:[#allocation2 + $0x8] sm:$0xff] %vm63_vm0, %v712_v22  ;;  %v711_v24 = vadd.f32 %v702_v23, %v628_v21 }
 0x385   :  { %713 = vst.msk [vmem:[#allocation2] sm:$0xff] %vm63_vm0, %v711_v24 }
 0x388   :  { %v1238_v31 = vpop.f32.mrf.mxu0 }
 0x38a   :  { %v725_v26 = vld [vmem:[#allocation2 + $0x8] sm:$0xff]  ;;  %v883_v36 = vpop.f32.mrf.mxu0 }
 0x38c   :  { %v724_v25 = vld [vmem:[#allocation2] sm:$0xff] }
 0x38d   :  { %1225 = vmatprep.mubr.msk.f32.mxu1 %vm63_vm0, %v724_v25 }
 0x38e   :  { %1226 = vmatmul.mubr.msk.f32.vlgmr.msra.gmra.mxu1 %vm63_vm0, %v725_v26 }
 0x38f   :  { %1240 = vmatpush3.msra.mxu1 %v918_v27 }
 0x390   :  { %1241 = vmatprep.subr.mxu1 %v917_v28 }
 0x391   :  { %1242 = vmatpush3.msra.mxu1 %v917_v28 }
 0x392   :  { %1243 = vmatprep.subr.mxu1 %v916_v29 }
 0x393   :  { %1244 = vmatpush3.msra.mxu1 %v916_v29 }
 0x394   :  { %1245 = vmatprep.subr.mxu1 %v915_v30 }
 0x395   :  { %1246 = vmatpush3.msra.mxu1 %v915_v30 }
 0x44e   :  { %v1227_v33 = vpop.f32.mrf.mxu1 }
 0x44f   :  { %v889_v35 = vadd.f32 %v1238_v31, %v1227_v33 }
 0x450   :  { %v802_v37 = vpop.f32.mrf.mxu1 }
 0x451   :  { %v900_v38 = vadd.f32 %v1096_v34, %v889_v35  ;;  %v884_v39 = vadd.f32 %v883_v36, %v802_v37 }
 0x453   :  { %v1098_v40 = vmul.f32 -1.442695, %v900_v38  ;;  %v899_v41 = vadd.f32 %v1096_v34, %v884_v39 }
 0x455   :  { %1286 = vpow2.f32 %v1098_v40  ;;  %v1097_v42 = vmul.f32 -1.442695, %v899_v41 }
 0x457   :  { %1288 = vpow2.f32 %v1097_v42 }
 0x462   :  { %v1287_v43 = vpop.eup %1286 }
 0x463   :  { %v908_v44 = vadd.f32 1.0, %v1287_v43 }
 0x464   :  { %v1289_v45 = vpop.eup %1288 }
 0x465   :  { %v907_v46 = vadd.f32 1.0, %v1289_v45  ;;  %1290 = vrcp.f32 %v908_v44 }
 0x467   :  { %1292 = vrcp.f32 %v907_v46 }
 0x472   :  { %v1291_v47 = vpop.eup %1290 }
 0x473   :  { %v914_v49 = vmul.f32 %v1291_v47, %v900_v38 }
 0x474   :  { %v1293_v48 = vpop.eup %1292 }
 0x475   :  { %v913_v32 = vmul.f32 %v1293_v48, %v899_v41 }
 0x477   :  { %1247 = vmatprep.mubr.msk.f32.mxu1 %vm63_vm0, %v913_v32 }
 0x478   :  { %1248 = vmatmul.mubr.msk.f32.vlgmr.msra.gmra.mxu1 %vm63_vm0, %v914_v49 }
 0x538   :  { %v1249_v51 = vpop.f32.mrf.mxu1 }
 0x539   :  { %v1004_v52 = vadd.f32 %v1249_v51, %v1099_v50 }
 0x53a   :  { %v998_v53 = vpop.f32.mrf.mxu1 }
 0x53b   :  { %v999_v54 = vadd.f32 %v1099_v50, %v998_v53  ;;  %v1010_v55 = vsel %vm63_vm0, %v1004_v52, 0.0 }
 0x53c   :  { %1011 = vadd.xlane.f32.xlu1 %v1010_v55 }
 0x53d   :  { %v1007_v56 = vsel %vm63_vm0, %v999_v54, 0.0 }
 0x53e   :  { %1008 = vadd.xlane.f32.xlu0 %v1007_v56 }
 0x5c5   :  { %v1012_v57 = vpop.xlane.xlu1 %1011 }
 0x5c6   :  { %v1015_v58 = vmul.f32 0.03125, %v1012_v57 }
 0x5c7   :  { %v1009_v59 = vpop.xlane.xlu0 %1008 }
 0x5c8   :  { %v1014_v60 = vmul.f32 0.03125, %v1009_v59  ;;  %v1017_v61 = vsub.f32 %v1004_v52, %v1015_v58 }
 0x5ca   :  { %v1016_v62 = vsub.f32 %v999_v54, %v1014_v60  ;;  %v1019_v1 = vmul.f32 %v1017_v61, %v1017_v61 }
 0x5cc   :  { %v1018_v63 = vmul.f32 %v1016_v62, %v1016_v62  ;;  %v1023_v2 = vsel %vm63_vm0, %v1019_v1, 0.0 }
 0x5ce   :  { %v1020_v0 = vsel %vm63_vm0, %v1018_v63, 0.0 }
 0x5cf   :  { %1021 = vadd.xlane.f32.xlu0 %v1020_v0 }
 0x5d3   :  { %1024 = vadd.xlane.f32.xlu0 %v1023_v2 }
 0x658   :  { %v1022_v3 = vpop.xlane.xlu0 %1021 }
 0x659   :  { %v1026_v4 = vmul.f32 0.03125, %v1022_v3 }
 0x65b   :  { %v1028_v5 = vadd.f32 1e-05, %v1026_v4 }
 0x65c   :  { %v1025_v6 = vpop.xlane.xlu0 %1024 }
 0x65d   :  { %1294 = vrsqrt.f32 %v1028_v5  ;;  %v1027_v7 = vmul.f32 0.03125, %v1025_v6 }
 0x65f   :  { %v1029_v9 = vadd.f32 1e-05, %v1027_v7 }
 0x661   :  { %1296 = vrsqrt.f32 %v1029_v9 }
 0x66a   :  { %v1295_v10 = vpop.eup %1294 }
 0x66b   :  { %v1032_v18 = vmul.f32 %v1295_v10, %v1016_v62 }
 0x66d   :  { %v1041_v14 = vmul.f32 %v1102_v11, %v1032_v18 }
 0x66e   :  { %v1297_v15 = vpop.eup %1296 }
 0x66f   :  { %v1050_v16 = vadd.f32 %v1103_v13, %v1041_v14  ;;  %v1033_v17 = vmul.f32 %v1297_v15, %v1017_v61 }
 0x671   :  { %v1052_v19 = vadd.f32 %v1050_v16, %v1419_v8  ;;  %v1042_v20 = vmul.f32 %v1102_v11, %v1033_v17 }
 0x673   :  { %1054 = vst.msk [vmem:[%s1614_s18] sm:$0xff] %vm63_vm0, %v1052_v19  ;;  %v1051_v21 = vadd.f32 %v1103_v13, %v1042_v20 }
 0x675   :  { %v1053_v22 = vadd.f32 %v1051_v21, %v1433_v12 }
 0x677   :  { %1055 = vst.msk [vmem:[%s1614_s18 + $0x8] sm:$0xff] %vm63_vm0, %v1053_v22 }

</bundles_post_ra>
